<compile_context>
chip_gen: v7x
topology: tpu7x:2x2x1
jax: 0.10.0
libtpu: 0.0.40
codegen_flags: <defaults>
</compile_context>

<pallas_src>
import jax
import jax.numpy as jnp
from jax.experimental import pallas as pl
from jax.experimental.pallas import tpu as pltpu


_TM_PREF = 512    # preferred output-tile rows (L axis); multiple of 8/16/32
_TN_PREF = 2048   # preferred output-tile cols (N axis); capped by VMEM budget
_MAX_TK = 1024    # max reduction tile (D axis)


def _vmem_capacity_bytes():
    """Physical VMEM per TensorCore (64 MiB on v7x, 128 MiB on v5e/v6e)."""
    try:
        info = pltpu.get_tpu_info()
        cap = getattr(info, "vmem_capacity_bytes", None)
        if cap:
            return int(cap)
    except Exception:
        pass
    return 64 * 1024 * 1024   # conservative (v7x-sized) fallback


def _sublane_align(itemsize):
    # 8 rows per sublane tile for 4-byte dtypes, 16 for 2-byte, 32 for 1-byte.
    return max(8, 32 // max(1, int(itemsize)))


def _tile_vmem_bytes(tm, tn, tk, b1, b2, bo, multi_k):
    # Double-buffered inputs + output, plus the (single) f32 accumulator.
    total = 2 * (tm * tk * b1 + tk * tn * b2 + tm * tn * bo)
    if multi_k:
        total += tm * tn * 4
    return total


def _choose_tiles(L, N, D, b1, b2, bo, budget):
    """Pick (tm, tn, tk, n_k) sized against the per-generation VMEM budget."""
    # Reduction tile: must divide D exactly (ragged K would add garbage into
    # the accumulator since Pallas does not zero-pad input edge blocks).
    if D <= _MAX_TK:
        tk = D                                   # single K step (head dims 64/128)
    else:
        tk = 0
        t = (_MAX_TK // 128) * 128
        while t >= 128:
            if D % t == 0:
                tk = t
                break
            t -= 128
        if tk == 0:
            tk = D                               # full-D fallback: always correct
    n_k = -(-D // tk)
    multi_k = n_k > 1

    sub = _sublane_align(min(b1, bo))

    # Output rows: full L if small (full-dim blocks are always legal), else a
    # 32-aligned preferred tile with a ragged (masked) edge block.
    tm = L if L <= _TM_PREF else _TM_PREF

    # Output cols: prefer a whole-N block (x2 block index then constant across
    # the L axis -> x2 stays VMEM-resident per batch-head), else the largest
    # lane-aligned tile that fits the budget.
    cands = []
    if N <= 2 * _TN_PREF:
        cands.append(N)
    cands += [t for t in (_TN_PREF, 1024, 512, 256, 128) if t < N]
    if not cands:
        cands = [N]
    tn = cands[-1]
    for cand in cands:
        if _tile_vmem_bytes(tm, cand, tk, b1, b2, bo, multi_k) <= budget:
            tn = cand
            break

    # If still over budget, shrink tm (keeping sublane alignment).
    while (_tile_vmem_bytes(tm, tn, tk, b1, b2, bo, multi_k) > budget
           and tm > sub):
        tm = max(sub, (tm // 2 // sub) * sub)

    return tm, tn, tk, n_k


def _make_kernels(precision):
    def single_k_kernel(x1_ref, x2_ref, o_ref):
        # x1_ref: (1, tm, tk)  x2_ref: (1, tk, tn)  o_ref: (1, tm, tn)
        # Single reduction step: no accumulator scratch, store directly.
        o_ref[0] = jnp.dot(
            x1_ref[0], x2_ref[0],
            preferred_element_type=jnp.float32,
            precision=precision).astype(o_ref.dtype)

    def multi_k_kernel(x1_ref, x2_ref, o_ref, acc_ref):
        # acc_ref: (tm, tn) f32, resident across the reduction (last) grid axis.
        k = pl.program_id(3)
        p = jnp.dot(x1_ref[0], x2_ref[0],
                    preferred_element_type=jnp.float32,
                    precision=precision)

        @pl.when(k == 0)
        def _first():
            acc_ref[...] = p          # direct store: no zero-fill + RMW pass

        @pl.when(k > 0)
        def _accum():
            acc_ref[...] += p

        @pl.when(k == pl.num_programs(3) - 1)
        def _finalize():
            o_ref[0] = acc_ref[...].astype(o_ref.dtype)

    return single_k_kernel, multi_k_kernel


def pallas_batched_matmul(x1, x2, *, out_dtype=None, fuse_pv_layout=False,
                          precision=None):
    """Batched matmul over the leading (B, H) dims.

    Returns (out, fused):
      * fused == False: out has shape (B, H, L, N).
      * fused == True (only if fuse_pv_layout and the PV output layout is
        legal / lane-dense): out has shape (B, L, H*N) with the PV
        transpose+reshape folded into the output BlockSpec.
    """
    B, H, L, D = x1.shape
    B2, H2, D2, N = x2.shape
    assert (B, H, D) == (B2, H2, D2), "shape mismatch"

    if out_dtype is None:
        out_dtype = jnp.result_type(x1.dtype, x2.dtype)
        # TODO(synk): integer inputs: torch.matmul keeps integer semantics; the
        # f32 MXU accumulation + final astype truncates (and v7x has no int
        # MXU at all) -- dequantize to bf16/fp8 upstream on v7x.

    b1 = jnp.dtype(x1.dtype).itemsize
    b2 = jnp.dtype(x2.dtype).itemsize
    bo = jnp.dtype(out_dtype).itemsize

    cap = _vmem_capacity_bytes()
    vmem_limit = int(min(int(cap * 0.80), 112 * 1024 * 1024))
    tile_budget = max(vmem_limit - 8 * 1024 * 1024, 4 * 1024 * 1024)

    tm, tn, tk, n_k = _choose_tiles(L, N, D, b1, b2, bo, tile_budget)

    BH = B * H
    x1f = x1.reshape(BH, L, D)
    x2f = x2.reshape(BH, D, N)

    gl = pl.cdiv(L, tm)
    gn = pl.cdiv(N, tn)

    # Fused PV layout requires blocks that line up with the (B, L, H*N) array:
    # tn must divide N and the last block dim must be lane-dense or full-dim.
    n_blocks_n = (N // tn) if (N % tn == 0) else None
    fuse = bool(fuse_pv_layout and n_blocks_n is not None
                and (tn % 128 == 0 or (H == 1 and tn == N)))

    single_k_kernel, multi_k_kernel = _make_kernels(precision)

    cost = pl.CostEstimate(
        flops=2 * BH * L * N * D,
        transcendentals=0,
        bytes_accessed=x1f.size * b1 + x2f.size * b2 + BH * L * N * bo)

    if n_k == 1:
        grid = (BH, gl, gn)
        in_specs = [
            pl.BlockSpec((1, tm, tk), lambda bh, li, ni: (bh, li, 0)),
            pl.BlockSpec((1, tk, tn), lambda bh, li, ni: (bh, 0, ni)),
        ]
        if fuse:
            out_shape = jax.ShapeDtypeStruct((B, L, H * N), out_dtype)
            out_specs = pl.BlockSpec(
                (1, tm, tn),
                lambda bh, li, ni: (bh // H, li, (bh % H) * n_blocks_n + ni))
        else:
            out_shape = jax.ShapeDtypeStruct((BH, L, N), out_dtype)
            out_specs = pl.BlockSpec((1, tm, tn),
                                     lambda bh, li, ni: (bh, li, ni))
        kernel = single_k_kernel
        scratch = []
        semantics = ("parallel", "parallel", "parallel")
    else:
        grid = (BH, gl, gn, n_k)          # reduction axis last
        in_specs = [
            pl.BlockSpec((1, tm, tk), lambda bh, li, ni, ki: (bh, li, ki)),
            pl.BlockSpec((1, tk, tn), lambda bh, li, ni, ki: (bh, ki, ni)),
        ]
        if fuse:
            out_shape = jax.ShapeDtypeStruct((B, L, H * N), out_dtype)
            out_specs = pl.BlockSpec(
                (1, tm, tn),
                lambda bh, li, ni, ki: (bh // H, li, (bh % H) * n_blocks_n + ni))
        else:
            out_shape = jax.ShapeDtypeStruct((BH, L, N), out_dtype)
            out_specs = pl.BlockSpec((1, tm, tn),
                                     lambda bh, li, ni, ki: (bh, li, ni))
        kernel = multi_k_kernel
        scratch = [pltpu.VMEM((tm, tn), jnp.float32)]
        semantics = ("parallel", "parallel", "parallel", "arbitrary")

    out = pl.pallas_call(
        kernel,
        out_shape=out_shape,
        grid_spec=pltpu.PrefetchScalarGridSpec(
            num_scalar_prefetch=0,
            grid=grid,
            in_specs=in_specs,
            out_specs=out_specs,
            scratch_shapes=scratch,
        ),
        compiler_params=pltpu.CompilerParams(
            dimension_semantics=semantics,
            vmem_limit_bytes=vmem_limit,
        ),
        cost_estimate=cost,
    )(x1f, x2f)

    if fuse:
        return out, True
    return out.reshape(B, H, L, N), False


class QuantMatmul:
    """JAX/Pallas mirror of quant.quant_ops.QuantMatmul (default-flag semantics)."""

    def __init__(self, is_pvmat=False, is_qkmat=False):
        # H (hadamard mixin) default flags -- all transforms disabled.
        self.use_hadamard_transform = False
        self.online_full_had = False
        self.online_partial_had = False
        self.had_K = None
        self.K = 1
        self.down_dim = 1
        self.fp32_had = False
        # QuantMatmul flags
        self.is_pvmat = is_pvmat
        self.is_qkmat = is_qkmat
        self.use_act_quant = False
        # TODO(synk): act_quantizer (Quantizer) is not defined in the reference
        # snippet and use_act_quant defaults to False, so it is not emitted.

    def may_hadamard_transform(self, out):
        # All hadamard flags are False with default __init__, so identity.
        # TODO(synk): online hadamard variants depend on external
        # hadamard_utils / fast_hadamard_transform; not translated.
        return out

    def __call__(self, x1, x2):
        # is_qkmat: torch casts both operands to f32 before the matmul.  The
        # MXU multiplies native-precision operands and accumulates in f32, so
        # we only force an f32 *output* (no f32 HBM copies of the inputs).
        # For bf16 inputs this is bit-equivalent to torch's float() upcast.
        out_dtype = jnp.float32 if self.is_qkmat else None

        # For genuinely-f32 inputs, torch.matmul is a true f32 matmul; TPU's
        # default precision decomposes it into bf16 passes, so use HIGHEST
        # (~3x MXU cost) for parity.  Narrow inputs keep the fast default.
        compute_dtype = jnp.result_type(x1.dtype, x2.dtype)
        precision = (jax.lax.Precision.HIGHEST
                     if compute_dtype == jnp.float32 else None)

        # Hadamard transforms are identity with the default flags, so the
        # pvmat transpose+reshape can be folded into the output BlockSpec.
        out, fused = pallas_batched_matmul(
            x1, x2, out_dtype=out_dtype,
            fuse_pv_layout=self.is_pvmat, precision=precision)
        out = self.may_hadamard_transform(out)
        if self.is_pvmat and not fused:
            b, h, l, c = out.shape
            out = jnp.transpose(out, (0, 2, 1, 3)).reshape(b, l, h * c)
        return out


if __name__ == "__main__":
    key = jax.random.PRNGKey(0)
    k1, k2, k3, k4, k5, k6 = jax.random.split(key, 6)
    hi = jax.lax.Precision.HIGHEST

    # --- default path: plain batched matmul --------------------------------
    B, H, L, D, N = 2, 4, 8, 32, 8
    x1 = jax.random.normal(k1, (B, H, L, D), dtype=jnp.float32)
    x2 = jax.random.normal(k2, (B, H, D, N), dtype=jnp.float32)

    mod = QuantMatmul()
    out = jax.block_until_ready(mod(x1, x2))
    ref = jnp.matmul(x1, x2, precision=hi)
    assert out.shape == (B, H, L, N)
    assert jnp.allclose(out, ref, atol=1e-5, rtol=1e-5), "default path mismatch"

    # --- qkmat path: f32 output ---------------------------------------------
    mod_qk = QuantMatmul(is_qkmat=True)
    out_qk = jax.block_until_ready(mod_qk(x1, x2))
    assert out_qk.dtype == jnp.float32
    assert jnp.allclose(out_qk, ref.astype(jnp.float32),
                        atol=1e-5, rtol=1e-5), "qkmat path mismatch"

    # --- pvmat path with a lane-dense N so the transpose+reshape is fused
    #     into the output BlockSpec ------------------------------------------
    Bp, Hp, Lp, Dp, Np = 1, 2, 8, 32, 128
    p = jax.random.normal(k3, (Bp, Hp, Lp, Dp), dtype=jnp.float32)
    v = jax.random.normal(k4, (Bp, Hp, Dp, Np), dtype=jnp.float32)
    mod_pv = QuantMatmul(is_pvmat=True)
    out_pv = jax.block_until_ready(mod_pv(p, v))
    ref_pv = jnp.matmul(p, v, precision=hi)
    ref_pv = jnp.transpose(ref_pv, (0, 2, 1, 3)).reshape(Bp, Lp, Hp * Np)
    assert out_pv.shape == (Bp, Lp, Hp * Np)
    assert jnp.allclose(out_pv, ref_pv, atol=1e-5, rtol=1e-5), "pvmat mismatch"

    # --- deep-reduction path (D > max tk) exercises the multi-K-step kernel
    #     with the resident f32 accumulator ----------------------------------
    Bk, Hk, Lk, Dk, Nk = 1, 2, 16, 2048, 128
    a = jax.random.normal(k5, (Bk, Hk, Lk, Dk), dtype=jnp.float32)
    b = jax.random.normal(k6, (Bk, Hk, Dk, Nk), dtype=jnp.float32)
    out_k = jax.block_until_ready(QuantMatmul()(a, b))
    ref_k = jnp.matmul(a, b, precision=hi)
    assert out_k.shape == (Bk, Hk, Lk, Nk)
    assert jnp.allclose(out_k, ref_k, atol=1e-3, rtol=1e-4), "multi-K mismatch"

    print("KERNEL_OK")
</pallas_src>

<mosaic_0001>
module attributes {stable_mosaic.version = 11 : i64} {
  func.func @single_k_kernel(%arg0: i32, %arg1: i32, %arg2: i32, %arg3: memref<1x8x32xf32, #tpu.memory_space<vmem>>, %arg4: memref<1x32x8xf32, #tpu.memory_space<vmem>>, %arg5: memref<1x8x8xf32, #tpu.memory_space<vmem>>) attributes {dimension_semantics = [#tpu.dimension_semantics<parallel>, #tpu.dimension_semantics<parallel>, #tpu.dimension_semantics<parallel>], iteration_bounds = array<i64: 8, 1, 1>, scalar_prefetch = 0 : i64, scratch_operands = 0 : i64, tpu.core_type = #tpu.core_type<tc>, window_params = [{transform_indices = @transform_0, window_bounds = array<i64: 1, 8, 32>}, {transform_indices = @transform_1, window_bounds = array<i64: 1, 32, 8>}, {transform_indices = @transform_2, window_bounds = array<i64: 1, 8, 8>}]} {
    %c0 = arith.constant 0 : index
    %c0_0 = arith.constant 0 : index
    %c0_1 = arith.constant 0 : index
    %0 = vector.load %arg3[%c0, %c0_0, %c0_1] : memref<1x8x32xf32, #tpu.memory_space<vmem>>, vector<1x8x32xf32>
    %1 = vector.shape_cast %0 : vector<1x8x32xf32> to vector<8x32xf32>
    %c0_2 = arith.constant 0 : index
    %c0_3 = arith.constant 0 : index
    %c0_4 = arith.constant 0 : index
    %2 = vector.load %arg4[%c0_2, %c0_3, %c0_4] : memref<1x32x8xf32, #tpu.memory_space<vmem>>, vector<1x32x8xf32>
    %3 = vector.shape_cast %2 : vector<1x32x8xf32> to vector<32x8xf32>
    %cst = arith.constant dense<0.000000e+00> : vector<8x8xf32>
    %4 = tpu.matmul %1, %3, %cst {dimension_numbers = #tpu.dot_dimension_numbers<[1], [0], [0], [1], [0, 0, 1, 1], [], []>, precision = #tpu.contract_precision<fp32>} : vector<8x32xf32>, vector<32x8xf32>, vector<8x8xf32> -> vector<8x8xf32>
    %c0_5 = arith.constant 0 : index
    %c0_6 = arith.constant 0 : index
    %c0_7 = arith.constant 0 : index
    %5 = vector.load %arg5[%c0_5, %c0_6, %c0_7] : memref<1x8x8xf32, #tpu.memory_space<vmem>>, vector<1x8x8xf32>
    %6 = vector.shape_cast %5 : vector<1x8x8xf32> to vector<8x8xf32>
    %7 = vector.shape_cast %4 : vector<8x8xf32> to vector<1x8x8xf32>
    tpu.vector_store %arg5[%c0_5, %c0_6, %c0_7], %7 {strides = array<i32>} : memref<1x8x8xf32, #tpu.memory_space<vmem>>, vector<1x8x8xf32>,
    return
  }
  func.func @transform_0(%arg0: i32, %arg1: i32, %arg2: i32) -> (i32, i32, i32) {
    %c0_i32 = arith.constant 0 : i32
    %c0_i32_0 = arith.constant 0 : i32
    return %arg0, %arg1, %c0_i32 : i32, i32, i32
  }
  func.func @transform_1(%arg0: i32, %arg1: i32, %arg2: i32) -> (i32, i32, i32) {
    %c0_i32 = arith.constant 0 : i32
    %c0_i32_0 = arith.constant 0 : i32
    return %arg0, %c0_i32, %arg2 : i32, i32, i32
  }
  func.func @transform_2(%arg0: i32, %arg1: i32, %arg2: i32) -> (i32, i32, i32) {
    %c0_i32 = arith.constant 0 : i32
    return %arg0, %arg1, %arg2 : i32, i32, i32
  }
}

</mosaic_0001>

<bundles_post_ra>
// kernel: tpu_custom_call.1
= control target key start
LH: loop header
LB: loop body
LE: loop exit
PB: predicated region body
PF: predicated region fallthrough
CT: control target
= control target key end

     0   :  { %7 = vsyncpa [#allocation3], 0  ;;  %s1260_s0 = inlined_call_operand.vmem [shape: f32[8,8,32], index: 0, kind: input, shape index: {}]   ;;  %s1261_s1 = inlined_call_operand.vmem [shape: f32[8,32,8], index: 1, kind: input, shape index: {}]   ;;  %s1262_s2 = inlined_call_operand.hbm [shape: f32[8,8,8], index: 2, kind: output, shape index: {}]  }
   0x1   :  { %9 = vsyncpa [#allocation3 + $0x1], 0  ;;  %s1121_s9 = smov 0   ;;  %s1123_s10 = smov 0  }
   0x2   :  { %s1125_s11 = smov 0   ;;  %s1127_s12 = smov 0  }
   0x3   :  { %s1129_s13 = smov 0   ;;  %s1131_s14 = smov 0  }
   0x4 LB: > { %s809_s15 = sadd.s32 4294967295, %s1100_s14   ;;  %s810_s16 = sadd.s32 4294967294, %s1100_s14   ;;  %s1100_s14 = sphi %s1131_s14, %s15_s14   ;;  %s1096_s13 = sphi %s1129_s13, %s1269_s13   ;;  %s1092_s12 = sphi %s1127_s12, %s1268_s12   ;;  %s1088_s11 = sphi %s1125_s11, %s1267_s11   ;;  %s1084_s10 = sphi %s1123_s10, %s1266_s10   ;;  %s1080_s9 = sphi %s1121_s9, %s1265_s9  }
   0x5   : > { %s34_s17 = sadd.s32 1, %s1096_s13  ;;  %s101_s18 = sadd.s32 1, %s1088_s11 }
   0x6   : > { %p36_p0 = scmp.ge.s32.totalorder %s34_s17, 8  ;;  %p111_p1 = scmp.ne.s32.totalorder %s1088_s11, %s1084_s10 }
   0x7   : > { %p112_p2 = scmp.eq.s32.totalorder %s809_s15, 7  ;;  %p117_p3 = scmp.ne.s32.totalorder %s1084_s10, %s1080_s9 }
   0x8   : > { %s1271_s17 = smov (%p36_p0, %s34_s17), 0  ;;  %p118_p5 = scmp.eq.s32.totalorder %s810_s16, 7 }
   0x9   : > { %p1161_p4 = por %p112_p2, %p111_p1  ;;  %s94_s20 = ssub.s32 %s1096_s13, %s1271_s17 }
   0xa   : > { %p813_p6 = scmp.ge.s32.totalorder %s1100_s14, 1  ;;  %p99_p7 = scmp.eq.s32.totalorder %s94_s20, 0 }
   0xb   : > { %p1168_p8 = por %p118_p5, %p117_p3  ;;  %p157_p9 = scmp.lt.s32.totalorder %s1100_s14, 9 }
   0xc   : > { %s1174_s22 = scalar_select %p99_p7, %s1088_s11, %s101_s18  }
   0xd   : > { %p158_p10 = pnand %p813_p6, %p157_p9 }
   0xe   : > { %p189_p11 = scmp.lt.s32.totalorder (!%p158_p10), %s1092_s12, 7  ;;  %v1102_v0 = vmov (!%p158_p10), 0.0|0.0   ;;  %vm1103_vm0 = vmmov (!%p158_p10), 0   ;;  %v1104_v1 = vmov (!%p158_p10), 0.0   ;;  %vm209_vm1 = vcmask (!%p158_p10), 261120   ;;  %s186_s4 = sand.u32 (!%p158_p10), 1, %s1084_s10  }
   0xf   : > { %161 = sbr.rel (%p158_p10) target bundleno = 284 (0x11c), region = 28  ;;  %919 = vmatprep.subr.bf16.mxu1 (!%p158_p10), %v1102_v0  ;;  %937 = vmatprep.subr.bf16.mxu0 (!%p158_p10), %v1102_v0  ;;  %s814_s5 = sshll.u32 (!%p158_p10), %s186_s4, 3  ;;  %vm698_vm2 = vcmask (!%p158_p10), 64512  }
  0x10   : > { %861 = vmatprep.mubr.msk.f32.mxu1 (!%p158_p10), %vm1103_vm0, %v1104_v1  ;;  %894 = vmatprep.mubr.msk.f32.mxu0 (!%p158_p10), %vm1103_vm0, %v1104_v1  ;;  %s819_s6 = sshll.u32 (!%p158_p10), %s1092_s12, 7  ;;  %s188_s7 = scalar_lea.vmem (!%p158_p10), [#allocation2], %s814_s5 }
  0x11   : > { %s716_s8 = sshll.u32 (!%p158_p10), %s188_s7, 4  ;;  %s1213_s18 = scalar_lea.hbm (!%p158_p10), %s1262_s2, %s819_s6  ;;  %s1215_s8 = int_to_ptr.vmem [resolvable:$true] %s716_s8 }
  0x12   : > { %s701_s20 = scalar_lea.sflag (!%p158_p10), [#allocation3], %s186_s4 }
  0x16   : > { %s190_s23 = scalar_select %p189_p11, %s1092_s12, 7 }
  0x17   : > { %s1022_s12 = scalar_lea.vmem %s1215_s8, 128 }
  0x18   : > { %s822_s24 = sshll.u32 %s190_s23, 5  ;;  %s815_s25 = sshll.u32 %s190_s23, 3 }
  0x19   : > { %s203_s28 = scalar_lea.vmem %s1261_s1, %s822_s24  ;;  %s195_s3 = scalar_lea.vmem %s1260_s0, %s815_s25 }
  0x1a   : > { %v205_v2 = vld [vmem:[%s203_s28] sm:$0xff]  ;;  %v206_v3 = vld [vmem:[%s203_s28 + $0x8] sm:$0xff]  ;;  %v207_v4 = vld [vmem:[%s203_s28 + $0x10] sm:$0xff]  ;;  %p1023_p12 = scmp.ne.s32.totalorder %s1215_s8, %s1022_s12  ;;  %s1105_s23 = smov [#allocation2]  }
  0x1b   : > { %v214_v5 = vand.u32 4294901760, %v205_v2  ;;  %v217_v6 = vand.u32 4294901760, %v206_v3  ;;  %v208_v7 = vld [vmem:[%s203_s28 + $0x18] sm:$0xff]  ;;  %v220_v8 = vand.u32 4294901760, %v207_v4  ;;  %v204_v9 = vld [vmem:[%s195_s3] sm:$0xff]  ;;  %s1026_s24 = sshll.u32 %s1105_s23, 4  ;;  %s1027_s24 = int_to_ptr.vmem [resolvable:$false] %s1026_s24 }
  0x1c   : > { %v223_v10 = vand.u32 4294901760, %v208_v7  ;;  %v211_v11 = vsel %vm209_vm1, %v204_v9, 0  ;;  %p1024_p13 = pnand %p1023_p12, %p1161_p4  ;;  %s1028_s25 = scalar_lea.vmem %s1027_s24, 256 }
  0x1d   : > { %v920_v12 = vpack.c.bf16 %v217_v6, %v214_v5  ;;  %v294_v13 = vsub.f32 %v205_v2, %v214_v5  ;;  %v301_v14 = vsub.f32 %v206_v3, %v217_v6  ;;  %v308_v15 = vsub.f32 %v207_v4, %v220_v8  ;;  %p1029_p1 = scmp.lt.s32.totalorder %s1215_s8, %s1027_s24  ;;  %p1030_p2 = scmp.lt.s32.totalorder %s1028_s25, %s1022_s12 }
  0x1e   : > { %v315_v16 = vsub.f32 %v208_v7, %v223_v10  ;;  %v282_v17 = vand.u32 4294901760, %v211_v11  ;;  %v923_v18 = vpack.c.bf16 %v223_v10, %v220_v8  ;;  %p1025_p0 = pneg %p1024_p13 }
  0x1f   : > { %921 = vmatpush3.bf16.msra.mxu1 %v920_v12  ;;  %939 = vmatpush3.bf16.msra.mxu0 %v920_v12  ;;  %v295_v19 = vand.u32 4294901760, %v294_v13  ;;  %v302_v20 = vand.u32 4294901760, %v301_v14  ;;  %v309_v21 = vand.u32 4294901760, %v308_v15  ;;  %v932_v39 = vpack.c.bf16 %v301_v14, %v294_v13  ;;  %p1031_p3 = por %p1030_p2, %p1029_p1 }
  0x20   : > { %922 = vmatprep.subr.bf16.mxu1 %v1102_v0  ;;  %940 = vmatprep.subr.bf16.mxu0 %v1102_v0  ;;  %v283_v22 = vsub.f32 %v211_v11, %v282_v17  ;;  %v316_v23 = vand.u32 4294901760, %v315_v16  ;;  %v935_v40 = vpack.c.bf16 %v315_v16, %v308_v15 }
  0x21   : > { %v296_v24 = vsub.f32 %v294_v13, %v295_v19  ;;  %v303_v25 = vsub.f32 %v301_v14, %v302_v20  ;;  %v310_v26 = vsub.f32 %v308_v15, %v309_v21  ;;  %v944_v31 = vpack.c.bf16 %v302_v20, %v295_v19  ;;  %p1032_p5 = pnand %p1031_p3, %p1025_p0 }
  0x22   : > { %v284_v27 = vand.u32 4294901760, %v283_v22  ;;  %v317_v28 = vsub.f32 %v315_v16, %v316_v23  ;;  %v947_v37 = vpack.c.bf16 %v316_v23, %v309_v21 }
  0x23   : > { %924 = vmatpush3.bf16.msra.mxu1 %v923_v18  ;;  %942 = vmatpush3.bf16.msra.mxu0 %v923_v18  ;;  %v297_v29 = vand.u32 4294901760, %v296_v24  ;;  %v304_v30 = vand.u32 4294901760, %v303_v25  ;;  %v311_v34 = vand.u32 4294901760, %v310_v26 }
  0x24   : > { %v285_v32 = vsub.f32 %v283_v22, %v284_v27  ;;  %925 = vmatprep.subr.bf16.mxu1 %v1102_v0  ;;  %943 = vmatprep.subr.bf16.mxu0 %v1102_v0  ;;  %v318_v35 = vand.u32 4294901760, %v317_v28 }
  0x25   : > { %v926_v33 = vpack.c.bf16 %v304_v30, %v297_v29 }
  0x26   : > { %v286_v36 = vand.u32 4294901760, %v285_v32  ;;  %895 = vmatmul.mubr.f32.vlgmr.msra.gmra.mrb[0].mxu0 %v284_v27  ;;  %v929_v38 = vpack.c.bf16 %v318_v35, %v311_v34 }
  0x27   : > { %945 = vmatpush3.bf16.msra.mxu0 %v944_v31  ;;  %905 = vmatprep.mubr.msk.f32.mxu0 %vm1103_vm0, %v1104_v1 }
  0x28   : > { %862 = vmatmul.mubr.f32.vlgmr.msra.gmra.mrb[0].mxu1 %v286_v36  ;;  %946 = vmatprep.subr.bf16.mxu0 %v1102_v0 }
  0x29   : > { %927 = vmatpush3.bf16.msra.mxu1 %v926_v33  ;;  %872 = vmatprep.mubr.msk.f32.mxu1 %vm1103_vm0, %v1104_v1 }
  0x2a   : > { %928 = vmatprep.subr.bf16.mxu1 %v1102_v0 }
  0x2b   : > { %948 = vmatpush3.bf16.msra.mxu0 %v947_v37 }
  0x2c   : > { %949 = vmatprep.subr.bf16.mxu0 %v1102_v0 }
  0x2d   : > { %930 = vmatpush3.bf16.msra.mxu1 %v929_v38 }
  0x2e   : > { %931 = vmatprep.subr.bf16.mxu1 %v1102_v0  ;;  %906 = vmatmul.mubr.f32.vlgmr.msra.gmra.mrb[0].mxu0 %v282_v17 }
  0x2f   : > { %951 = vmatpush3.bf16.msra.mxu0 %v920_v12  ;;  %916 = vmatprep.mubr.msk.f32.mxu0 %vm1103_vm0, %v1104_v1 }
  0x30   : > { %873 = vmatmul.mubr.f32.vlgmr.msra.gmra.mrb[0].mxu1 %v282_v17  ;;  %952 = vmatprep.subr.bf16.mxu0 %v1102_v0 }
  0x31   : > { %933 = vmatpush3.bf16.msra.mxu1 %v932_v39  ;;  %883 = vmatprep.mubr.msk.f32.mxu1 %vm1103_vm0, %v1104_v1 }
  0x32   : > { %934 = vmatprep.subr.bf16.mxu1 %v1102_v0 }
  0x33   : > { %954 = vmatpush3.bf16.msra.mxu0 %v923_v18 }
  0x35   : > { %936 = vmatpush3.bf16.msra.mxu1 %v935_v40 }
  0x36   : > { %917 = vmatmul.mubr.f32.vlgmr.msra.gmra.mrb[0].mxu0 %v282_v17 }
  0x38   : > { %884 = vmatmul.mubr.f32.vlgmr.msra.gmra.mrb[0].mxu1 %v283_v22 }
 0x109   : > { %v694_v41 = vpop.f32.mrb[0].mxu0 }
 0x10a   : > { %v918_v42 = vpop.f32.mrb[1].mxu0 }
 0x10b   : > { %v459_v43 = vpop.f32.mrb[0].mxu1 }
 0x10c   : > { %v955_v44 = vadd.f32 %v694_v41, %v459_v43  ;;  %v885_v45 = vpop.f32.mrb[1].mxu1 }
 0x10e   : > { %699 = vst.msk [vmem:[%s188_s7] sm:$0xff] %vm698_vm2, %v955_v44 }
 0x10f   : > { %1035 = shalt.err (!%p1032_p5)
}
 0x110   : > { %s1036_s26 = scalar_lea.hbm %s1213_s18, 128  ;;  %s1040_s29 = scalar_lea.hbm %s1262_s2, 1024 }
 0x111   : > { %p1037_p6 = scmp.ne.s32.totalorder %s1213_s18, %s1036_s26  ;;  %p1041_p10 = scmp.lt.u32.totalorder %s1213_s18, %s1262_s2 }
 0x112   : > { %p1042_p11 = scmp.lt.u32.totalorder %s1040_s29, %s1036_s26  ;;  %p1044_p13 = scmp.lt.u32.totalorder %s1036_s26, %s1213_s18 }
 0x113   : > { %p1038_p7 = pnand %p1037_p6, %p1161_p4 }
 0x114   : > { %p1043_p12 = por %p1042_p11, %p1041_p10 }
 0x115   : > { %p1039_p9 = pneg %p1038_p7 }
 0x116   : > { %p1045_p0 = por %p1044_p13, %p1043_p12 }
 0x118   : > { %p1046_p1 = pnand %p1045_p0, %p1039_p9 }
 0x11a   : > { %1049 = shalt.err (!%p1046_p1)
}
 0x11b   : > { %964 = dma.vmem_to_hbm [thread:$0]  (%p1161_p4), %s1215_s8, 128, %s1213_s18, %s701_s20  }
 0x11c PF: > { %p970_p2 = scmp.ge.s32.totalorder %s1100_s14, 2  ;;  %s728_s4 = sand.u32 1, %s1080_s9  }
 0x11d   : > { %s729_s5 = scalar_lea.sflag [#allocation3], %s728_s4 }
 0x11e   : > { %p967_p3 = pnand %p970_p2, %p1168_p8 }
 0x120   : > { %1075 = dma.done.wait (!%p967_p3), %s729_s5, 128  }
 0x121   : > { %1077 = vsyncadd (!%p967_p3), %s729_s5, 4294967168  ;;  %s15_s14 = sadd.s32 1, %s1100_s14   ;;  %s1265_s9 = smov %s1084_s10 }
 0x122   : > { %p12_p5 = scmp.ge.s32.totalorder %s15_s14, 10   ;;  %s1266_s10 = smov %s1088_s11 }
 0x123   : > { %s1267_s11 = smov %s1174_s22  ;;  %s1268_s12 = smov %s1096_s13 }
 0x124   : > { %s1269_s13 = smov %s1271_s17  ;;  %14 = sbr.rel (!%p12_p5) target bundleno = 4 (0x4), region = 66 }
 0x12b   :  { %734 = vsyncpa [#allocation3], 1 }
 0x12c   :  { %736 = vsyncpa [#allocation3 + $0x1], 1 }

</bundles_post_ra>
